<compile_context>
chip_gen: v7x
topology: tpu7x:2x2x1
jax: 0.10.0
libtpu: 0.0.40
codegen_flags: <defaults>
</compile_context>

<pallas_src>
import functools
import math

import jax
import jax.numpy as jnp
from jax import lax
from jax.experimental import pallas as pl
from jax.experimental.pallas import tpu as pltpu


def _round_up(x, m):
    return ((x + m - 1) // m) * m


def _accum_step(x_ref, w_ref, m_ref, acc_ref, compute_dtype):
    """One K-chunk of the masked matmul into the f32 accumulator."""
    @pl.when(pl.program_id(2) == 0)
    def _():
        acc_ref[...] = jnp.zeros_like(acc_ref)

    # Mask application on the VPU; mask stored as bf16 (exact for {0,1}),
    # upcast to the weight dtype so the elementwise multiply stays f32.
    w_masked = w_ref[...] * m_ref[...].astype(w_ref.dtype)      # (tn, tk)
    x_blk = x_ref[...]                                          # (tm, tk)
    if compute_dtype is not None:
        x_blk = x_blk.astype(compute_dtype)
        w_masked = w_masked.astype(compute_dtype)

    # Contract over in_features of both operands: (tm, tk) x (tn, tk) -> (tm, tn).
    # No transpose is materialized (MXU handles the transposed-RHS feed).
    acc_ref[...] += lax.dot_general(
        x_blk, w_masked,
        dimension_numbers=(((1,), (1,)), ((), ())),
        preferred_element_type=jnp.float32)


def _masked_linear_bias_kernel(x_ref, w_ref, m_ref, b_ref, o_ref, acc_ref,
                               *, compute_dtype):
    _accum_step(x_ref, w_ref, m_ref, acc_ref, compute_dtype)

    @pl.when(pl.program_id(2) == pl.num_programs(2) - 1)
    def _():
        # f32 epilogue: bias add on the accumulator, then a single cast.
        o_ref[...] = (acc_ref[...] + b_ref[...].astype(jnp.float32)
                      ).astype(o_ref.dtype)


def _masked_linear_nobias_kernel(x_ref, w_ref, m_ref, o_ref, acc_ref,
                                 *, compute_dtype):
    _accum_step(x_ref, w_ref, m_ref, acc_ref, compute_dtype)

    @pl.when(pl.program_id(2) == pl.num_programs(2) - 1)
    def _():
        o_ref[...] = acc_ref[...].astype(o_ref.dtype)


def bio_stream_linear(x, weight, mask, bias=None, *, compute_dtype=None,
                      tm=None, tn=None, tk=None):
    """Pallas implementation of BioStreamLinear.forward.

    x      : (..., in_features)
    weight : (out_features, in_features)
    mask   : (out_features, in_features)  (0/1)
    bias   : (out_features,) or None
    compute_dtype : optional MXU input dtype (e.g. jnp.bfloat16 on v6e/v7x);
                    None keeps full f32 inputs.  Accumulation is always f32.
    """
    out_features, in_features = weight.shape

    # F.linear supports arbitrary leading dims -> flatten them (glue).
    lead_shape = x.shape[:-1]
    x2d = x.reshape(-1, in_features)
    batch = x2d.shape[0]

    # Tile selection: lane-dense output (tn multiple of 128), K-reduction last.
    # Defaults stay well under the v7x 32 MiB scoped / 64 MiB physical VMEM
    # even with double-buffered inputs, and also fit v5e/v6e.
    if tm is None:
        tm = min(256, _round_up(max(batch, 1), 8))
    if tn is None:
        tn = min(256, _round_up(out_features, 128))
    if tk is None:
        tk = min(512, _round_up(in_features, 128))

    M = _round_up(batch, tm)
    N = _round_up(out_features, tn)
    K = _round_up(in_features, tk)

    # Zero-padding is exact: padded K contributes 0; padded rows/cols sliced off.
    x_p = jnp.zeros((M, K), x2d.dtype).at[:batch, :in_features].set(x2d)
    w_p = jnp.zeros((N, K), weight.dtype).at[:out_features, :in_features].set(weight)
    m_p = jnp.zeros((N, K), jnp.bfloat16).at[:out_features, :in_features].set(
        mask.astype(jnp.bfloat16))

    grid = (M // tm, N // tn, K // tk)

    x_spec = pl.BlockSpec((tm, tk), lambda i, j, k: (i, k))
    w_spec = pl.BlockSpec((tn, tk), lambda i, j, k: (j, k))
    m_spec = pl.BlockSpec((tn, tk), lambda i, j, k: (j, k))
    o_spec = pl.BlockSpec((tm, tn), lambda i, j, k: (i, j))

    compiler_params = pltpu.CompilerParams(
        dimension_semantics=("parallel", "parallel", "arbitrary"),
        vmem_limit_bytes=32 * 1024 * 1024)

    if bias is not None:
        b_p = jnp.zeros((1, N), jnp.float32).at[0, :out_features].set(
            bias.astype(jnp.float32))
        b_spec = pl.BlockSpec((1, tn), lambda i, j, k: (0, j))
        out = pl.pallas_call(
            functools.partial(_masked_linear_bias_kernel,
                              compute_dtype=compute_dtype),
            out_shape=jax.ShapeDtypeStruct((M, N), x2d.dtype),
            grid_spec=pltpu.PrefetchScalarGridSpec(
                num_scalar_prefetch=0,
                grid=grid,
                in_specs=[x_spec, w_spec, m_spec, b_spec],
                out_specs=o_spec,
                scratch_shapes=[pltpu.VMEM((tm, tn), jnp.float32)]),
            compiler_params=compiler_params,
        )(x_p, w_p, m_p, b_p)
    else:
        out = pl.pallas_call(
            functools.partial(_masked_linear_nobias_kernel,
                              compute_dtype=compute_dtype),
            out_shape=jax.ShapeDtypeStruct((M, N), x2d.dtype),
            grid_spec=pltpu.PrefetchScalarGridSpec(
                num_scalar_prefetch=0,
                grid=grid,
                in_specs=[x_spec, w_spec, m_spec],
                out_specs=o_spec,
                scratch_shapes=[pltpu.VMEM((tm, tn), jnp.float32)]),
            compiler_params=compiler_params,
        )(x_p, w_p, m_p)

    out = out[:batch, :out_features]
    return out.reshape(*lead_shape, out_features)


def init_bio_stream_linear(key, in_features, out_features, mask, use_bias=True):
    """Deterministic parameter init mirroring the PyTorch module's __init__."""
    mask = jnp.asarray(mask, dtype=jnp.float32)
    # PyTorch: if mask is (in, out), transpose it to (out, in).
    if mask.shape[0] == in_features and mask.shape[1] == out_features:
        mask = mask.T

    k_w, k_b = jax.random.split(key)

    # kaiming_uniform_(a=sqrt(5)) -> uniform(-bound, bound), bound = 1/sqrt(fan_in)
    fan_in = in_features
    w_bound = 1.0 / math.sqrt(fan_in)
    weight = jax.random.uniform(
        k_w, (out_features, in_features), dtype=jnp.float32,
        minval=-w_bound, maxval=w_bound)
    weight = weight * mask        # __init__ masks the stored weight as well

    if use_bias:
        b_bound = 1.0 / math.sqrt(fan_in)
        bias = jax.random.uniform(
            k_b, (out_features,), dtype=jnp.float32,
            minval=-b_bound, maxval=b_bound)
    else:
        bias = None

    # TODO(synk): the PyTorch gradient hook (mask_gradient) is a training-time
    # autograd feature with no forward-pass Pallas equivalent.
    return weight, mask, bias


if __name__ == "__main__":
    key = jax.random.PRNGKey(0)
    k_in, k_mask, k_par, k_in2, k_mask2, k_par2 = jax.random.split(key, 6)

    # --- test 1: small layer with bias (single grid step, padded to 128 lanes)
    batch, in_features, out_features = 8, 32, 16
    x = jax.random.normal(k_in, (batch, in_features), dtype=jnp.float32)
    mask_in_out = (jax.random.uniform(k_mask, (in_features, out_features)) > 0.5
                   ).astype(jnp.float32)
    weight, mask, bias = init_bio_stream_linear(
        k_par, in_features, out_features, mask_in_out, use_bias=True)

    y = jax.block_until_ready(bio_stream_linear(x, weight, mask, bias))
    y_ref = x @ (weight * mask).T + bias[None, :]
    assert y.shape == (batch, out_features)
    assert jnp.allclose(y, y_ref, atol=1e-4, rtol=1e-4)

    # --- test 2: larger layer, no bias, multi-tile grid with K reduction
    batch2, in2, out2 = 16, 384, 256
    x2 = jax.random.normal(k_in2, (batch2, in2), dtype=jnp.float32)
    mask2 = (jax.random.uniform(k_mask2, (out2, in2)) > 0.5).astype(jnp.float32)
    w2, m2, _ = init_bio_stream_linear(k_par2, in2, out2, mask2, use_bias=False)

    y2 = jax.block_until_ready(
        bio_stream_linear(x2, w2, m2, None, tn=128, tk=128))   # grid (1, 2, 3)
    y2_ref = x2 @ (w2 * m2).T
    assert y2.shape == (batch2, out2)
    assert jnp.allclose(y2, y2_ref, atol=1e-4, rtol=1e-4)

    print("KERNEL_OK")
</pallas_src>

<mosaic_0001>
module attributes {stable_mosaic.version = 11 : i64} {
  func.func @_masked_linear_bias_kernel(%arg0: i32, %arg1: i32, %arg2: i32, %arg3: memref<8x128xf32, #tpu.memory_space<vmem>>, %arg4: memref<128x128xf32, #tpu.memory_space<vmem>>, %arg5: memref<128x128xbf16, #tpu.memory_space<vmem>>, %arg6: memref<1x128xf32, #tpu.memory_space<vmem>>, %arg7: memref<8x128xf32, #tpu.memory_space<vmem>>, %arg8: memref<8x128xf32, #tpu.memory_space<vmem>>) attributes {dimension_semantics = [#tpu.dimension_semantics<parallel>, #tpu.dimension_semantics<parallel>, #tpu.dimension_semantics<arbitrary>], iteration_bounds = array<i64: 1, 1, 1>, scalar_prefetch = 0 : i64, scratch_operands = 1 : i64, tpu.core_type = #tpu.core_type<tc>, window_params = [{transform_indices = @transform_0, window_bounds = array<i64: 8, 128>}, {transform_indices = @transform_1, window_bounds = array<i64: 128, 128>}, {transform_indices = @transform_2, window_bounds = array<i64: 128, 128>}, {transform_indices = @transform_3, window_bounds = array<i64: 1, 128>}, {transform_indices = @transform_4, window_bounds = array<i64: 8, 128>}]} {
    %c0_i32 = arith.constant 0 : i32
    %0 = arith.cmpi eq, %arg2, %c0_i32 : i32
    %1 = arith.extui %0 : i1 to i32
    %c0_i32_0 = arith.constant 0 : i32
    %2 = arith.cmpi ne, %1, %c0_i32_0 : i32
    scf.if %2 {
      %cst_12 = arith.constant 0.000000e+00 : f32
      %15 = vector.broadcast %cst_12 : f32 to vector<8x128xf32>
      %c0_13 = arith.constant 0 : index
      %c0_14 = arith.constant 0 : index
      %16 = vector.load %arg8[%c0_13, %c0_14] : memref<8x128xf32, #tpu.memory_space<vmem>>, vector<8x128xf32>
      tpu.vector_store %arg8[%c0_13, %c0_14], %15 {strides = array<i32>} : memref<8x128xf32, #tpu.memory_space<vmem>>, vector<8x128xf32>,
    } else {
    }
    %c0 = arith.constant 0 : index
    %c0_1 = arith.constant 0 : index
    %3 = vector.load %arg4[%c0, %c0_1] : memref<128x128xf32, #tpu.memory_space<vmem>>, vector<128x128xf32>
    %c0_2 = arith.constant 0 : index
    %c0_3 = arith.constant 0 : index
    %4 = vector.load %arg5[%c0_2, %c0_3] : memref<128x128xbf16, #tpu.memory_space<vmem>>, vector<128x128xbf16>
    %5 = arith.extf %4 : vector<128x128xbf16> to vector<128x128xf32>
    %6 = arith.mulf %3, %5 : vector<128x128xf32>
    %c0_4 = arith.constant 0 : index
    %c0_5 = arith.constant 0 : index
    %7 = vector.load %arg3[%c0_4, %c0_5] : memref<8x128xf32, #tpu.memory_space<vmem>>, vector<8x128xf32>
    %c0_6 = arith.constant 0 : index
    %c0_7 = arith.constant 0 : index
    %8 = vector.load %arg8[%c0_6, %c0_7] : memref<8x128xf32, #tpu.memory_space<vmem>>, vector<8x128xf32>
    %cst = arith.constant dense<0.000000e+00> : vector<8x128xf32>
    %9 = tpu.matmul %7, %6, %cst {dimension_numbers = #tpu.dot_dimension_numbers<[1], [1], [0], [0], [0, 0, 1, 0], [], []>} : vector<8x128xf32>, vector<128x128xf32>, vector<8x128xf32> -> vector<8x128xf32>
    %10 = arith.addf %8, %9 : vector<8x128xf32>
    %c0_8 = arith.constant 0 : index
    %c0_9 = arith.constant 0 : index
    %11 = vector.load %arg8[%c0_8, %c0_9] : memref<8x128xf32, #tpu.memory_space<vmem>>, vector<8x128xf32>
    tpu.vector_store %arg8[%c0_8, %c0_9], %10 {strides = array<i32>} : memref<8x128xf32, #tpu.memory_space<vmem>>, vector<8x128xf32>,
    %c0_i32_10 = arith.constant 0 : i32
    %12 = arith.cmpi eq, %arg2, %c0_i32_10 : i32
    %13 = arith.extui %12 : i1 to i32
    %c0_i32_11 = arith.constant 0 : i32
    %14 = arith.cmpi ne, %13, %c0_i32_11 : i32
    scf.if %14 {
      %c0_12 = arith.constant 0 : index
      %c0_13 = arith.constant 0 : index
      %15 = vector.load %arg8[%c0_12, %c0_13] : memref<8x128xf32, #tpu.memory_space<vmem>>, vector<8x128xf32>
      %c0_14 = arith.constant 0 : index
      %c0_15 = arith.constant 0 : index
      %16 = vector.load %arg6[%c0_14, %c0_15] : memref<1x128xf32, #tpu.memory_space<vmem>>, vector<1x128xf32>
      %17 = vector.broadcast %16 : vector<1x128xf32> to vector<8x128xf32>
      %18 = arith.addf %15, %17 : vector<8x128xf32>
      %c0_16 = arith.constant 0 : index
      %c0_17 = arith.constant 0 : index
      %19 = vector.load %arg7[%c0_16, %c0_17] : memref<8x128xf32, #tpu.memory_space<vmem>>, vector<8x128xf32>
      tpu.vector_store %arg7[%c0_16, %c0_17], %18 {strides = array<i32>} : memref<8x128xf32, #tpu.memory_space<vmem>>, vector<8x128xf32>,
    } else {
    }
    return
  }
  func.func @transform_0(%arg0: i32, %arg1: i32, %arg2: i32) -> (i32, i32) {
    %c0_i32 = arith.constant 0 : i32
    return %arg0, %arg2 : i32, i32
  }
  func.func @transform_1(%arg0: i32, %arg1: i32, %arg2: i32) -> (i32, i32) {
    %c0_i32 = arith.constant 0 : i32
    return %arg1, %arg2 : i32, i32
  }
  func.func @transform_2(%arg0: i32, %arg1: i32, %arg2: i32) -> (i32, i32) {
    %c0_i32 = arith.constant 0 : i32
    return %arg1, %arg2 : i32, i32
  }
  func.func @transform_3(%arg0: i32, %arg1: i32, %arg2: i32) -> (i32, i32) {
    %c0_i32 = arith.constant 0 : i32
    %c0_i32_0 = arith.constant 0 : i32
    return %c0_i32, %arg1 : i32, i32
  }
  func.func @transform_4(%arg0: i32, %arg1: i32, %arg2: i32) -> (i32, i32) {
    %c0_i32 = arith.constant 0 : i32
    return %arg0, %arg1 : i32, i32
  }
}

</mosaic_0001>

<bundles_post_ra>
// kernel: tpu_custom_call.1
= control target key start
LH: loop header
LB: loop body
LE: loop exit
PB: predicated region body
PF: predicated region fallthrough
CT: control target
= control target key end

     0   :  { %9 = vsyncpa [#allocation4], 0  ;;  %s545_s0 = inlined_call_operand.hbm [shape: f32[8,128], index: 0, kind: input, shape index: {}]   ;;  %s546_s1 = inlined_call_operand.hbm [shape: f32[128,128], index: 1, kind: input, shape index: {}]   ;;  %s547_s2 = inlined_call_operand.hbm [shape: bf16[128,128], index: 2, kind: input, shape index: {}]   ;;  %s548_s3 = inlined_call_operand.vmem [shape: f32[1,128], index: 3, kind: input, shape index: {}]   ;;  %s549_s4 = inlined_call_operand.hbm [shape: f32[8,128], index: 4, kind: output, shape index: {}]  }
   0x1   :  { %10 = vsyncpa [#allocation7], 0 }
   0x2   :  { %11 = vsyncpa [#allocation5], 0  ;;  %s450_s15 = smov [#allocation6]   ;;  %s356_s19 = scalar_lea.hbm %s546_s1, 2048 }
   0x3   :  { %s27_s16 = sshll.u32 %s450_s15, 4  ;;  %p357_p0 = scmp.ne.s32.totalorder %s546_s1, %s356_s19  ;;  %s28_s16 = int_to_ptr.vmem [resolvable:$true] %s27_s16 }
   0x4   :  { %p360_p1 = scmp.lt.u32.totalorder %s356_s19, %s546_s1 }
   0x6   :  { %p362_p2 = pnand %p360_p1, %p357_p0 }
   0x8   :  { %365 = shalt.err (!%p362_p2)
}
   0x9   :  { %s366_s24 = scalar_lea.vmem %s28_s16, 2048  ;;  %p371_p4 = scmp.lt.s32.totalorder %s28_s16, %s28_s16 }
   0xa   :  { %p367_p3 = scmp.ne.s32.totalorder %s28_s16, %s366_s24  ;;  %p372_p5 = scmp.lt.s32.totalorder %s366_s24, %s366_s24 }
   0xc   :  { %p373_p6 = por %p372_p5, %p371_p4 }
   0xe   :  { %p374_p7 = pnand %p373_p6, %p367_p3 }
  0x10   :  { %377 = shalt.err (!%p374_p7)
}
  0x11   :  { %s451_s25 = smov 128   ;;  %s452_s26 = smov 8  }
  0x12   :  { %33 = dma.hbm_to_vmem [thread:$0]  %s546_s1, 2048, %s28_s16, [#allocation7], %s451_s25, %s451_s25, %s452_s26  }
  0x13   :  { %s453_s29 = smov [#allocation3]   ;;  %s454_s5 = smov [#allocation8]  }
  0x14   :  { %s18_s30 = sshll.u32 %s453_s29, 4  ;;  %s39_s6 = sshll.u32 %s454_s5, 4  ;;  %s19_s30 = int_to_ptr.vmem [resolvable:$true] %s18_s30  ;;  %s40_s6 = int_to_ptr.vmem [resolvable:$true] %s39_s6 }
  0x15   :  { %s378_s9 = scalar_lea.hbm %s545_s0, 128 }
  0x16   :  { %p379_p8 = scmp.ne.s32.totalorder %s545_s0, %s378_s9  ;;  %p382_p9 = scmp.lt.u32.totalorder %s378_s9, %s545_s0 }
  0x18   :  { %p384_p10 = pnand %p382_p9, %p379_p8 }
  0x1a   :  { %387 = shalt.err (!%p384_p10)
}
  0x1b   :  { %s388_s1 = scalar_lea.vmem %s19_s30, 128  ;;  %p393_p12 = scmp.lt.s32.totalorder %s19_s30, %s19_s30 }
  0x1c   :  { %p389_p11 = scmp.ne.s32.totalorder %s19_s30, %s388_s1  ;;  %p394_p13 = scmp.lt.s32.totalorder %s388_s1, %s388_s1 }
  0x1e   :  { %p395_p0 = por %p394_p13, %p393_p12 }
  0x20   :  { %p396_p1 = pnand %p395_p0, %p389_p11 }
  0x22   :  { %399 = shalt.err (!%p396_p1)
}
  0x23   :  { %21 = dma.hbm_to_vmem [thread:$0]  %s545_s0, 128, %s19_s30, [#allocation4]  }
  0x24   :  { %s400_s18 = scalar_lea.hbm %s547_s2, 1024 }
  0x25   :  { %p401_p2 = scmp.ne.s32.totalorder %s547_s2, %s400_s18  ;;  %p404_p3 = scmp.lt.u32.totalorder %s400_s18, %s547_s2 }
  0x27   :  { %p406_p4 = pnand %p404_p3, %p401_p2 }
  0x29   :  { %409 = shalt.err (!%p406_p4)
}
  0x2a   :  { %s410_s23 = scalar_lea.vmem %s40_s6, 1024  ;;  %p415_p6 = scmp.lt.s32.totalorder %s40_s6, %s40_s6 }
  0x2b   :  { %p411_p5 = scmp.ne.s32.totalorder %s40_s6, %s410_s23  ;;  %p416_p7 = scmp.lt.s32.totalorder %s410_s23, %s410_s23 }
  0x2d   :  { %p417_p8 = por %p416_p7, %p415_p6 }
  0x2f   :  { %p418_p9 = pnand %p417_p8, %p411_p5 }
  0x31   :  { %421 = shalt.err (!%p418_p9)
}
  0x32   :  { %s455_s0 = smov 64   ;;  %s456_s24 = smov 4  }
  0x33   :  { %45 = dma.hbm_to_vmem [thread:$0]  %s547_s2, 1024, %s40_s6, [#allocation7], %s455_s0, %s455_s0, %s456_s24  }
  0x34   :  { %444 = dma.done.wait [#allocation4], 128  }
  0x35   :  { %445 = vsyncadd [#allocation4], 4294967168 }
  0x36   :  { %446 = dma.done.wait [#allocation7], 3072  }
  0x37   :  { %447 = vsyncadd [#allocation7], 4294964224  ;;  %v457_v0 = vmov 0.0|0.0   ;;  %vm458_vm0 = vmmov 0   ;;  %v459_v1 = vmov 0.0   ;;  %v62_v2 = vld [vmem:[#allocation6] sm:$0xff] }
  0x38   :  { %321 = vmatprep.subr.bf16.mxu0 %v457_v0  ;;  %318 = vmatprep.mubr.msk.f32.mxu0 %vm458_vm0, %v459_v1  ;;  %v63_v3 = vld [vmem:[#allocation6 + $0x8] sm:$0xff]  ;;  %v231_v4 = vld [vmem:[#allocation8] sm:$0xff]   ;;  %v64_v12 = vld [vmem:[#allocation6 + $0x10] sm:$0xff]  ;;  %s460_s28 = smov [#allocation9]  }
  0x39   :  { %v232_v5 = vunpack.c.l.bf16 %v231_v4  ;;  %v233_v6 = vunpack.c.h.bf16 %v231_v4  ;;  %v262_v7 = vld [vmem:[#allocation8 + $0x8] sm:$0xff]   ;;  %v65_v13 = vld [vmem:[#allocation6 + $0x18] sm:$0xff]  ;;  %v263_v17 = vld [vmem:[#allocation8 + $0x10] sm:$0xff]   ;;  %s219_s29 = sshll.u32 %s460_s28, 4  ;;  %s220_s29 = int_to_ptr.vmem [resolvable:$true] %s219_s29 }
  0x3a   :  { %v236_v10 = vunpack.c.l.bf16 %v262_v7  ;;  %v237_v11 = vunpack.c.h.bf16 %v262_v7  ;;  %v240_v19 = vunpack.c.l.bf16 %v263_v17  ;;  %v241_v20 = vunpack.c.h.bf16 %v263_v17  ;;  %v66_v21 = vld [vmem:[#allocation6 + $0x20] sm:$0xff]  ;;  %v67_v22 = vld [vmem:[#allocation6 + $0x28] sm:$0xff]  ;;  %v264_v25 = vld [vmem:[#allocation8 + $0x18] sm:$0xff]   ;;  %s422_s30 = scalar_lea.vmem %s220_s29, 128  ;;  %p427_p11 = scmp.lt.s32.totalorder %s220_s29, %s220_s29 }
  0x3b   :  { %v110_v8 = vmul.f32 %v232_v5, %v62_v2  ;;  %v111_v9 = vmul.f32 %v233_v6, %v63_v3  ;;  %v244_v27 = vunpack.c.l.bf16 %v264_v25  ;;  %v245_v28 = vunpack.c.h.bf16 %v264_v25  ;;  %v68_v29 = vld [vmem:[#allocation6 + $0x30] sm:$0xff]  ;;  %v69_v30 = vld [vmem:[#allocation6 + $0x38] sm:$0xff]  ;;  %v265_v33 = vld [vmem:[#allocation8 + $0x20] sm:$0xff]   ;;  %p423_p10 = scmp.ne.s32.totalorder %s220_s29, %s422_s30  ;;  %p428_p12 = scmp.lt.s32.totalorder %s422_s30, %s422_s30 }
  0x3c   :  { %v112_v15 = vmul.f32 %v236_v10, %v64_v12  ;;  %v113_v16 = vmul.f32 %v237_v11, %v65_v13  ;;  %v114_v23 = vmul.f32 %v240_v19, %v66_v21  ;;  %v115_v24 = vmul.f32 %v241_v20, %v67_v22  ;;  %v70_v37 = vld [vmem:[#allocation6 + $0x40] sm:$0xff]  ;;  %v71_v38 = vld [vmem:[#allocation6 + $0x48] sm:$0xff]  ;;  %v72_v45 = vld [vmem:[#allocation6 + $0x50] sm:$0xff] }
  0x3d   :  { %v322_v14 = vpack.c.bf16 %v111_v9, %v110_v8  ;;  %v116_v31 = vmul.f32 %v244_v27, %v68_v29  ;;  %v117_v32 = vmul.f32 %v245_v28, %v69_v30  ;;  %v248_v35 = vunpack.c.l.bf16 %v265_v33  ;;  %v266_v41 = vld [vmem:[#allocation8 + $0x28] sm:$0xff]   ;;  %v73_v46 = vld [vmem:[#allocation6 + $0x58] sm:$0xff]  ;;  %v267_v49 = vld [vmem:[#allocation8 + $0x30] sm:$0xff]   ;;  %p429_p13 = por %p428_p12, %p427_p11 }
  0x3e   :  { %v325_v18 = vpack.c.bf16 %v113_v16, %v112_v15  ;;  %v328_v26 = vpack.c.bf16 %v115_v24, %v114_v23  ;;  %v249_v36 = vunpack.c.h.bf16 %v265_v33  ;;  %v252_v43 = vunpack.c.l.bf16 %v266_v41  ;;  %v74_v53 = vld [vmem:[#allocation6 + $0x60] sm:$0xff]  ;;  %v75_v54 = vld [vmem:[#allocation6 + $0x68] sm:$0xff]  ;;  %v268_v57 = vld [vmem:[#allocation8 + $0x38] sm:$0xff]  }
  0x3f   :  { %323 = vmatpush3.bf16.xpose.msra.mxu0 %v322_v14  ;;  %v331_v34 = vpack.c.bf16 %v117_v32, %v116_v31  ;;  %v118_v39 = vmul.f32 %v248_v35, %v70_v37  ;;  %v253_v44 = vunpack.c.h.bf16 %v266_v41  ;;  %v256_v51 = vunpack.c.l.bf16 %v267_v49  ;;  %v76_v61 = vld [vmem:[#allocation6 + $0x70] sm:$0xff]  ;;  %v77_v62 = vld [vmem:[#allocation6 + $0x78] sm:$0xff]  ;;  %p430_p0 = pnand %p429_p13, %p423_p10 }
  0x40   :  { %324 = vmatprep.subr.bf16.mxu0 %v457_v0  ;;  %v119_v40 = vmul.f32 %v249_v36, %v71_v38  ;;  %v120_v47 = vmul.f32 %v252_v43, %v72_v45  ;;  %v257_v52 = vunpack.c.h.bf16 %v267_v49  ;;  %v260_v59 = vunpack.c.l.bf16 %v268_v57  ;;  %v126_v3 = vld [vmem:[#allocation3] sm:$0xff] }
  0x41   :  { %v121_v48 = vmul.f32 %v253_v44, %v73_v46  ;;  %v122_v55 = vmul.f32 %v256_v51, %v74_v53  ;;  %v261_v60 = vunpack.c.h.bf16 %v268_v57  ;;  %v229_v4 = vld [vmem:[%s548_s3] ss:$0 sm:$0xff] }
  0x42   :  { %v334_v42 = vpack.c.bf16 %v119_v40, %v118_v39  ;;  %v123_v56 = vmul.f32 %v257_v52, %v75_v54  ;;  %v124_v63 = vmul.f32 %v260_v59, %v76_v61 }
  0x43   :  { %v337_v50 = vpack.c.bf16 %v121_v48, %v120_v47  ;;  %v125_v1 = vmul.f32 %v261_v60, %v77_v62 }
  0x44   :  { %v340_v58 = vpack.c.bf16 %v123_v56, %v122_v55 }
  0x45   :  { %v343_v2 = vpack.c.bf16 %v125_v1, %v124_v63 }
  0x47   :  { %326 = vmatpush3.bf16.xpose.msra.mxu0 %v325_v18 }
  0x48   :  { %327 = vmatprep.subr.bf16.mxu0 %v457_v0 }
  0x4f   :  { %329 = vmatpush3.bf16.xpose.msra.mxu0 %v328_v26 }
  0x50   :  { %330 = vmatprep.subr.bf16.mxu0 %v457_v0 }
  0x57   :  { %332 = vmatpush3.bf16.xpose.msra.mxu0 %v331_v34 }
  0x58   :  { %333 = vmatprep.subr.bf16.mxu0 %v457_v0 }
  0x5f   :  { %335 = vmatpush3.bf16.xpose.msra.mxu0 %v334_v42 }
  0x60   :  { %336 = vmatprep.subr.bf16.mxu0 %v457_v0 }
  0x67   :  { %338 = vmatpush3.bf16.xpose.msra.mxu0 %v337_v50 }
  0x68   :  { %339 = vmatprep.subr.bf16.mxu0 %v457_v0 }
  0x6f   :  { %341 = vmatpush3.bf16.xpose.msra.mxu0 %v340_v58 }
  0x70   :  { %342 = vmatprep.subr.bf16.mxu0 %v457_v0 }
  0x77   :  { %344 = vmatpush3.bf16.xpose.msra.mxu0 %v343_v2 }
  0x7e   :  { %319 = vmatmul.mubr.f32.vlgmr.msra.gmra.mrb[0].mxu0 %v126_v3 }
 0x151   :  { %v194_v5 = vpop.f32.mrb[0].mxu0 }
 0x152   :  { %v211_v6 = vadd.f32 %v229_v4, %v194_v5  ;;  %v320_v7 = vpop.f32.mrb[1].mxu0 }
 0x154   :  { %212 = vst [vmem:[#allocation9] sm:$0xff] %v211_v6 }
 0x155   :  { %433 = shalt.err (!%p430_p0)
}
 0x156   :  { %s434_s7 = scalar_lea.hbm %s549_s4, 128 }
 0x157   :  { %p435_p1 = scmp.ne.s32.totalorder %s549_s4, %s434_s7  ;;  %p438_p2 = scmp.lt.u32.totalorder %s434_s7, %s549_s4 }
 0x159   :  { %p440_p3 = pnand %p438_p2, %p435_p1 }
 0x15b   :  { %443 = shalt.err (!%p440_p3)
}
 0x15c   :  { %222 = dma.vmem_to_hbm [thread:$0]  %s220_s29, 128, %s549_s4, [#allocation5]  }
 0x15d   :  { %448 = dma.done.wait [#allocation5], 128  }
 0x15e   :  { %449 = vsyncadd [#allocation5], 4294967168 }
 0x15f   :  { %226 = vsyncpa [#allocation4], 1 }
 0x160   :  { %227 = vsyncpa [#allocation7], 1 }
 0x161   :  { %228 = vsyncpa [#allocation5], 1 }

</bundles_post_ra>
